<compile_context>
chip_gen: v7x
topology: tpu7x:2x2x1
jax: 0.10.0
libtpu: 0.0.40
codegen_flags: <defaults>
</compile_context>

<pallas_src>
import math

import jax
import jax.numpy as jnp
from jax.experimental import pallas as pl
from jax.experimental.pallas import tpu as pltpu


def _pair(x):
    if isinstance(x, (tuple, list)):
        return tuple(x)
    return (x, x)


def _round_up(x, m):
    return ((x + m - 1) // m) * m


def _tiling(L, K, l_tile, k_tile):
    """Lane-aligned tile sizes and padded extents.

    L is the lane axis of every block -> l_tile multiple of 128.
    K is the second-minor (sublane) axis -> multiple of 16 (bf16 packing);
    when K fits in a single tile we use the minimal padded extent.
    """
    lt = min(_round_up(l_tile, 128), _round_up(L, 128))
    L_pad = _round_up(L, lt)

    k_req = max(16, _round_up(k_tile, 16))
    K16 = _round_up(K, 16)
    if K16 <= k_req:
        kt, K_pad = K16, K16                 # single K tile, minimal padding
    else:
        kt = _round_up(k_tile, 128)
        K_pad = _round_up(K, kt)
    return lt, kt, L_pad, K_pad


def _vmem_limit_bytes(N, C_out, kt, lt, compute_itemsize):
    """Scoped-VMEM budget from the tile math (double-buffered inputs + output
    accumulator + headroom for the in-kernel f32 cast/product temporaries)."""
    cols_blk = N * kt * lt * compute_itemsize
    w_blk = C_out * kt * lt * compute_itemsize
    b_blk = C_out * lt * 4
    out_blk = N * C_out * lt * 4
    temps = 4 * kt * lt * 4
    need = 2 * (cols_blk + w_blk + b_blk) + 2 * out_blk + temps
    # Floor keeps small problems comfortably double-buffered; cap respects the
    # 64 MiB physical VMEM on v7x (v5e/v6e have 128 MiB, so 64 MiB is safe).
    return int(min(64 * 1024 * 1024, max(32 * 1024 * 1024, 2 * need)))


# ---------------------------------------------------------------------------
# Pallas kernel (all blocks lane-dense in L):
#   cols_ref: (N,     k_tile, l_tile)  compute_dtype
#   w_ref   : (C_out, k_tile, l_tile)  compute_dtype
#   b_ref   : (C_out, l_tile)          f32
#   o_ref   : (N, C_out, l_tile)       f32   (resident accumulator over K axis)
# ---------------------------------------------------------------------------
def _local_conv_kernel(cols_ref, w_ref, b_ref, o_ref):
    k_step = pl.program_id(1)
    N = cols_ref.shape[0]
    C_out = w_ref.shape[0]

    @pl.when(k_step == 0)
    def _init():
        # Initialize the resident f32 accumulator with the bias (added once).
        o_ref[...] = jnp.broadcast_to(b_ref[...][None], o_ref.shape)

    # VPU contraction: out[n, oc, l] += sum_k cols[n, k, l] * w[oc, k, l]
    # L on lanes, K on sublanes.  Products are exact in f32 (bf16 inputs are
    # cast up first); accumulation stays in f32.
    for n in range(N):                                   # static, tiny
        c = cols_ref[n].astype(jnp.float32)              # (k_tile, l_tile)
        rows = []
        for oc in range(C_out):                          # static, tiny
            w = w_ref[oc].astype(jnp.float32)            # (k_tile, l_tile)
            rows.append(jnp.sum(c * w, axis=0, keepdims=True))   # (1, l_tile)
        o_ref[n] = o_ref[n] + jnp.concatenate(rows, axis=0)      # (C_out, l_tile)


def _conv2d_local_core(cols, w, b, l_tile, k_tile):
    """cols: (N, K_pad, L_pad); w: (C_out, K_pad, L_pad); b: (C_out, L_pad).
    Returns (N, C_out, L_pad) float32."""
    N, K_pad, L_pad = cols.shape
    C_out = w.shape[0]
    n_l, n_k = L_pad // l_tile, K_pad // k_tile
    vmem_bytes = _vmem_limit_bytes(N, C_out, k_tile, l_tile, cols.dtype.itemsize)

    return pl.pallas_call(
        _local_conv_kernel,
        out_shape=jax.ShapeDtypeStruct((N, C_out, L_pad), jnp.float32),
        grid_spec=pltpu.PrefetchScalarGridSpec(
            num_scalar_prefetch=0,
            grid=(n_l, n_k),                              # K reduction innermost
            in_specs=[
                pl.BlockSpec((N, k_tile, l_tile), lambda l, k: (0, k, l)),
                pl.BlockSpec((C_out, k_tile, l_tile), lambda l, k: (0, k, l)),
                pl.BlockSpec((C_out, l_tile), lambda l, k: (0, l)),
            ],
            out_specs=pl.BlockSpec((N, C_out, l_tile), lambda l, k: (0, 0, l)),
        ),
        compiler_params=pltpu.CompilerParams(
            dimension_semantics=("parallel", "arbitrary"),
            vmem_limit_bytes=vmem_bytes,
        ),
    )(cols, w, b)


def _extract_patches(x, kH, kW, stride, padding, dilation):
    """F.unfold equivalent: returns (N, K, L) with K = C*kH*kW channel-major."""
    # TODO(synk): fuse the unfold into the kernel (stream x from HBM with
    # memory_space=pl.ANY and build patch blocks in-kernel) to avoid
    # materializing the kH*kW-times-larger cols tensor for big kernels.
    N, C, H, W = x.shape
    sh, sw = stride
    ph, pw = padding
    dh, dw = dilation
    outH = (H + 2 * ph - dh * (kH - 1) - 1) // sh + 1
    outW = (W + 2 * pw - dw * (kW - 1) - 1) // sw + 1
    xp = jnp.pad(x, ((0, 0), (0, 0), (ph, ph), (pw, pw)))
    patches = []
    for kh in range(kH):
        for kw in range(kW):
            sl = xp[:, :,
                    kh * dh: kh * dh + sh * (outH - 1) + 1: sh,
                    kw * dw: kw * dw + sw * (outW - 1) + 1: sw]   # (N,C,outH,outW)
            patches.append(sl)
    p = jnp.stack(patches, axis=2)                   # (N, C, kH*kW, outH, outW)
    cols = p.reshape(N, C * kH * kW, outH * outW)    # (N, K, L), matches unfold
    return cols, outH, outW


def _prep_cols(cols_nkl, L_pad, K_pad, compute_dtype):
    """Keep unfold's native (N, K, L) layout (L lane-dense); pad + cast only."""
    N, K, L = cols_nkl.shape
    cols = jnp.pad(cols_nkl, ((0, 0), (0, K_pad - K), (0, L_pad - L)))
    return cols.astype(compute_dtype)                              # (N, K_pad, L_pad)


def _prep_weight_bias(weight, bias, L_pad, K_pad, compute_dtype):
    """Torch-layout weight/bias -> kernel layout (L lane-dense). Done once."""
    outH, outW, outC, inC, kH, kW = weight.shape
    L, K = outH * outW, inC * kH * kW
    w = weight.reshape(L, outC, K)
    w = jnp.transpose(w, (1, 2, 0))                                # (C_out, K, L)
    w = jnp.pad(w, ((0, 0), (0, K_pad - K), (0, L_pad - L))).astype(compute_dtype)
    if bias is None:
        b = jnp.zeros((outC, L_pad), jnp.float32)                  # bias-free path
    else:
        b = jnp.pad(bias.reshape(outC, L).astype(jnp.float32),
                    ((0, 0), (0, L_pad - L)))
    return w, b


def conv2d_local(x, weight, bias=None, stride=1, padding=0, dilation=1,
                 l_tile=1024, k_tile=256, compute_dtype=jnp.bfloat16):
    """x: (N, C_in, H, W); weight: (outH, outW, C_out, C_in, kH, kW);
    bias: (C_out, outH, outW) or None. Returns (N, C_out, outH, outW) f32.

    compute_dtype=jnp.bfloat16 halves the dominant weight-streaming HBM traffic
    (~1e-2-level error vs f32); pass jnp.float32 for exact f32 parity."""
    stride, padding, dilation = _pair(stride), _pair(padding), _pair(dilation)
    outH, outW, outC, inC, kH, kW = weight.shape
    N = x.shape[0]

    cols_nkl, oH, oW = _extract_patches(x, kH, kW, stride, padding, dilation)
    assert (oH, oW) == (outH, outW)
    L, K = outH * outW, inC * kH * kW
    lt, kt, L_pad, K_pad = _tiling(L, K, l_tile, k_tile)

    w, b = _prep_weight_bias(weight, bias, L_pad, K_pad, compute_dtype)
    cols = _prep_cols(cols_nkl, L_pad, K_pad, compute_dtype)

    out = _conv2d_local_core(cols, w, b, lt, kt)        # (N, C_out, L_pad)
    return out[:, :, :L].reshape(N, outC, outH, outW)   # reshape only, no transpose


class Conv2dLocal:
    """JAX port of the PyTorch Conv2dLocal module (forward only)."""

    def __init__(self, in_height, in_width, in_channels, out_channels,
                 kernel_size, stride=1, padding=0, bias=True, dilation=1,
                 l_tile=1024, k_tile=256, compute_dtype=jnp.bfloat16,
                 key=None):
        if key is None:
            key = jax.random.PRNGKey(0)
        self.kernel_size = _pair(kernel_size)
        self.stride = _pair(stride)
        self.padding = _pair(padding)
        self.dilation = _pair(dilation)
        self.out_channels = out_channels
        kH, kW = self.kernel_size
        self.out_height = int(math.floor(
            (in_height + 2 * self.padding[0] - self.dilation[0] * (kH - 1) - 1)
            / self.stride[0] + 1))
        self.out_width = int(math.floor(
            (in_width + 2 * self.padding[1] - self.dilation[1] * (kW - 1) - 1)
            / self.stride[1] + 1))

        n = in_channels * kH * kW
        stdv = 1.0 / math.sqrt(n)
        kw_, kb_ = jax.random.split(key)
        self.weight = jax.random.uniform(
            kw_, (self.out_height, self.out_width, out_channels, in_channels, kH, kW),
            dtype=jnp.float32, minval=-stdv, maxval=stdv)
        self.bias = (jax.random.uniform(
            kb_, (out_channels, self.out_height, self.out_width),
            dtype=jnp.float32, minval=-stdv, maxval=stdv) if bias else None)

        # Hoisted out of the per-call path: weight/bias are put into kernel
        # layout (compute_dtype, padded, lane-dense L) exactly once.
        L, K = self.out_height * self.out_width, in_channels * kH * kW
        self._L = L
        self._compute_dtype = compute_dtype
        self._l_tile, self._k_tile, self._L_pad, self._K_pad = _tiling(
            L, K, l_tile, k_tile)
        self._w_kernel, self._b_kernel = _prep_weight_bias(
            self.weight, self.bias, self._L_pad, self._K_pad, compute_dtype)

    def __call__(self, x):
        kH, kW = self.kernel_size
        cols_nkl, oH, oW = _extract_patches(x, kH, kW, self.stride,
                                            self.padding, self.dilation)
        cols = _prep_cols(cols_nkl, self._L_pad, self._K_pad, self._compute_dtype)
        out = _conv2d_local_core(cols, self._w_kernel, self._b_kernel,
                                 self._l_tile, self._k_tile)
        N = x.shape[0]
        return out[:, :, :self._L].reshape(
            N, self.out_channels, self.out_height, self.out_width)


def _reference(x, weight, bias, stride, padding, dilation):
    """Pure-JAX f32 reference of conv2d_local for correctness checking."""
    stride, padding, dilation = _pair(stride), _pair(padding), _pair(dilation)
    outH, outW, outC, inC, kH, kW = weight.shape
    cols_nkl, oH, oW = _extract_patches(x, kH, kW, stride, padding, dilation)
    L, K = oH * oW, inC * kH * kW
    w = weight.reshape(L, outC, K)
    out = jnp.einsum('nkl,lok->nol', cols_nkl, w)      # (N, C_out, L)
    out = out.reshape(x.shape[0], outC, oH, oW)
    if bias is not None:
        out = out + bias[None]
    return out


if __name__ == "__main__":
    key = jax.random.PRNGKey(0)

    # ---- Test 1: small shapes consistent with the module (orig: 21ch, 321x321, k=30).
    # Single K tile -> exercises the collapsed-reduction path (bias init + one step).
    N, C_in, H, W = 2, 4, 16, 16
    C_out, ksz = 4, 3
    kx, kp = jax.random.split(key)
    x = jax.random.normal(kx, (N, C_in, H, W), dtype=jnp.float32)
    layer = Conv2dLocal(H, W, C_in, C_out, ksz, stride=1, padding=0, bias=True,
                        dilation=1, key=kp)
    out = jax.block_until_ready(layer(x))
    ref = _reference(x, layer.weight, layer.bias, layer.stride, layer.padding,
                     layer.dilation)
    assert out.shape == (N, C_out, layer.out_height, layer.out_width), out.shape
    err = float(jnp.max(jnp.abs(out - ref)))
    assert err < 2e-2, f"test1 mismatch vs reference: max abs err {err}"

    # ---- Test 2: exercises the multi-tile grid (2 L-tiles x 2 K-tiles), i.e. the
    # in-place K-reduction accumulation with bias written on the first K step.
    N2, C_in2, H2, W2, C_out2, k2 = 2, 8, 16, 16, 4, 5
    kx2, kp2 = jax.random.split(kp)
    x2 = jax.random.normal(kx2, (N2, C_in2, H2, W2), dtype=jnp.float32)
    layer2 = Conv2dLocal(H2, W2, C_in2, C_out2, k2, stride=1, padding=0,
                         bias=True, dilation=1, key=kp2)
    out2 = jax.block_until_ready(
        conv2d_local(x2, layer2.weight, layer2.bias, stride=1, padding=0,
                     dilation=1, l_tile=128, k_tile=128))
    ref2 = _reference(x2, layer2.weight, layer2.bias, 1, 0, 1)
    assert out2.shape == ref2.shape, (out2.shape, ref2.shape)
    err2 = float(jnp.max(jnp.abs(out2 - ref2)))
    assert err2 < 2e-2, f"test2 mismatch vs reference: max abs err {err2}"

    print("KERNEL_OK")
</pallas_src>

<mosaic_0001>
module attributes {stable_mosaic.version = 11 : i64} {
  func.func @_local_conv_kernel(%arg0: i32, %arg1: i32, %arg2: memref<2x48x256xbf16, #tpu.memory_space<vmem>>, %arg3: memref<4x48x256xbf16, #tpu.memory_space<vmem>>, %arg4: memref<4x256xf32, #tpu.memory_space<vmem>>, %arg5: memref<2x4x256xf32, #tpu.memory_space<vmem>>) attributes {dimension_semantics = [#tpu.dimension_semantics<parallel>, #tpu.dimension_semantics<arbitrary>], iteration_bounds = array<i64: 1, 1>, scalar_prefetch = 0 : i64, scratch_operands = 0 : i64, tpu.core_type = #tpu.core_type<tc>, window_params = [{transform_indices = @transform_0, window_bounds = array<i64: 2, 48, 256>}, {transform_indices = @transform_1, window_bounds = array<i64: 4, 48, 256>}, {transform_indices = @transform_2, window_bounds = array<i64: 4, 256>}, {transform_indices = @transform_3, window_bounds = array<i64: 2, 4, 256>}]} {
    %c0_i32 = arith.constant 0 : i32
    %0 = arith.cmpi eq, %arg1, %c0_i32 : i32
    %1 = arith.extui %0 : i1 to i32
    %c0_i32_0 = arith.constant 0 : i32
    %2 = arith.cmpi ne, %1, %c0_i32_0 : i32
    scf.if %2 {
      %c0_46 = arith.constant 0 : index
      %c0_47 = arith.constant 0 : index
      %71 = vector.load %arg4[%c0_46, %c0_47] : memref<4x256xf32, #tpu.memory_space<vmem>>, vector<4x256xf32>
      %72 = vector.shape_cast %71 : vector<4x256xf32> to vector<1x4x256xf32>
      %73 = vector.shape_cast %72 : vector<1x4x256xf32> to vector<1x4x256xf32>
      %74 = vector.broadcast %73 : vector<1x4x256xf32> to vector<2x4x256xf32>
      %c0_48 = arith.constant 0 : index
      %c0_49 = arith.constant 0 : index
      %c0_50 = arith.constant 0 : index
      %75 = vector.load %arg5[%c0_48, %c0_49, %c0_50] : memref<2x4x256xf32, #tpu.memory_space<vmem>>, vector<2x4x256xf32>
      tpu.vector_store %arg5[%c0_48, %c0_49, %c0_50], %74 {strides = array<i32>} : memref<2x4x256xf32, #tpu.memory_space<vmem>>, vector<2x4x256xf32>,
    } else {
    }
    %c0 = arith.constant 0 : index
    %c0_1 = arith.constant 0 : index
    %c0_2 = arith.constant 0 : index
    %3 = vector.load %arg2[%c0, %c0_1, %c0_2] : memref<2x48x256xbf16, #tpu.memory_space<vmem>>, vector<1x48x256xbf16>
    %4 = vector.shape_cast %3 : vector<1x48x256xbf16> to vector<48x256xbf16>
    %5 = arith.extf %4 : vector<48x256xbf16> to vector<48x256xf32>
    %c0_3 = arith.constant 0 : index
    %c0_4 = arith.constant 0 : index
    %c0_5 = arith.constant 0 : index
    %6 = vector.load %arg3[%c0_3, %c0_4, %c0_5] : memref<4x48x256xbf16, #tpu.memory_space<vmem>>, vector<1x48x256xbf16>
    %7 = vector.shape_cast %6 : vector<1x48x256xbf16> to vector<48x256xbf16>
    %8 = arith.extf %7 : vector<48x256xbf16> to vector<48x256xf32>
    %9 = arith.mulf %5, %8 : vector<48x256xf32>
    %cst = arith.constant dense<0.000000e+00> : vector<256xf32>
    %10 = vector.multi_reduction <add>, %9, %cst [0] : vector<48x256xf32> to vector<256xf32>
    %11 = vector.shape_cast %10 : vector<256xf32> to vector<1x256xf32>
    %c1 = arith.constant 1 : index
    %c0_6 = arith.constant 0 : index
    %c0_7 = arith.constant 0 : index
    %12 = vector.load %arg3[%c1, %c0_6, %c0_7] : memref<4x48x256xbf16, #tpu.memory_space<vmem>>, vector<1x48x256xbf16>
    %13 = vector.shape_cast %12 : vector<1x48x256xbf16> to vector<48x256xbf16>
    %14 = arith.extf %13 : vector<48x256xbf16> to vector<48x256xf32>
    %15 = arith.mulf %5, %14 : vector<48x256xf32>
    %cst_8 = arith.constant dense<0.000000e+00> : vector<256xf32>
    %16 = vector.multi_reduction <add>, %15, %cst_8 [0] : vector<48x256xf32> to vector<256xf32>
    %17 = vector.shape_cast %16 : vector<256xf32> to vector<1x256xf32>
    %c2 = arith.constant 2 : index
    %c0_9 = arith.constant 0 : index
    %c0_10 = arith.constant 0 : index
    %18 = vector.load %arg3[%c2, %c0_9, %c0_10] : memref<4x48x256xbf16, #tpu.memory_space<vmem>>, vector<1x48x256xbf16>
    %19 = vector.shape_cast %18 : vector<1x48x256xbf16> to vector<48x256xbf16>
    %20 = arith.extf %19 : vector<48x256xbf16> to vector<48x256xf32>
    %21 = arith.mulf %5, %20 : vector<48x256xf32>
    %cst_11 = arith.constant dense<0.000000e+00> : vector<256xf32>
    %22 = vector.multi_reduction <add>, %21, %cst_11 [0] : vector<48x256xf32> to vector<256xf32>
    %23 = vector.shape_cast %22 : vector<256xf32> to vector<1x256xf32>
    %c3 = arith.constant 3 : index
    %c0_12 = arith.constant 0 : index
    %c0_13 = arith.constant 0 : index
    %24 = vector.load %arg3[%c3, %c0_12, %c0_13] : memref<4x48x256xbf16, #tpu.memory_space<vmem>>, vector<1x48x256xbf16>
    %25 = vector.shape_cast %24 : vector<1x48x256xbf16> to vector<48x256xbf16>
    %26 = arith.extf %25 : vector<48x256xbf16> to vector<48x256xf32>
    %27 = arith.mulf %5, %26 : vector<48x256xf32>
    %cst_14 = arith.constant dense<0.000000e+00> : vector<256xf32>
    %28 = vector.multi_reduction <add>, %27, %cst_14 [0] : vector<48x256xf32> to vector<256xf32>
    %29 = vector.shape_cast %28 : vector<256xf32> to vector<1x256xf32>
    %c0_15 = arith.constant 0 : index
    %c0_16 = arith.constant 0 : index
    %c0_17 = arith.constant 0 : index
    %30 = vector.load %arg5[%c0_15, %c0_16, %c0_17] : memref<2x4x256xf32, #tpu.memory_space<vmem>>, vector<1x4x256xf32>
    %31 = vector.shape_cast %30 : vector<1x4x256xf32> to vector<4x256xf32>
    %32 = tpu.concatenate %11, %17, %23, %29 in 0 : vector<1x256xf32>, vector<1x256xf32>, vector<1x256xf32>, vector<1x256xf32> -> vector<4x256xf32>
    %33 = arith.addf %31, %32 : vector<4x256xf32>
    %c0_18 = arith.constant 0 : index
    %c0_19 = arith.constant 0 : index
    %c0_20 = arith.constant 0 : index
    %34 = vector.load %arg5[%c0_18, %c0_19, %c0_20] : memref<2x4x256xf32, #tpu.memory_space<vmem>>, vector<1x4x256xf32>
    %35 = vector.shape_cast %34 : vector<1x4x256xf32> to vector<4x256xf32>
    %36 = vector.shape_cast %33 : vector<4x256xf32> to vector<1x4x256xf32>
    tpu.vector_store %arg5[%c0_18, %c0_19, %c0_20], %36 {strides = array<i32>} : memref<2x4x256xf32, #tpu.memory_space<vmem>>, vector<1x4x256xf32>,
    %c1_21 = arith.constant 1 : index
    %c0_22 = arith.constant 0 : index
    %c0_23 = arith.constant 0 : index
    %37 = vector.load %arg2[%c1_21, %c0_22, %c0_23] : memref<2x48x256xbf16, #tpu.memory_space<vmem>>, vector<1x48x256xbf16>
    %38 = vector.shape_cast %37 : vector<1x48x256xbf16> to vector<48x256xbf16>
    %39 = arith.extf %38 : vector<48x256xbf16> to vector<48x256xf32>
    %c0_24 = arith.constant 0 : index
    %c0_25 = arith.constant 0 : index
    %c0_26 = arith.constant 0 : index
    %40 = vector.load %arg3[%c0_24, %c0_25, %c0_26] : memref<4x48x256xbf16, #tpu.memory_space<vmem>>, vector<1x48x256xbf16>
    %41 = vector.shape_cast %40 : vector<1x48x256xbf16> to vector<48x256xbf16>
    %42 = arith.extf %41 : vector<48x256xbf16> to vector<48x256xf32>
    %43 = arith.mulf %39, %42 : vector<48x256xf32>
    %cst_27 = arith.constant dense<0.000000e+00> : vector<256xf32>
    %44 = vector.multi_reduction <add>, %43, %cst_27 [0] : vector<48x256xf32> to vector<256xf32>
    %45 = vector.shape_cast %44 : vector<256xf32> to vector<1x256xf32>
    %c1_28 = arith.constant 1 : index
    %c0_29 = arith.constant 0 : index
    %c0_30 = arith.constant 0 : index
    %46 = vector.load %arg3[%c1_28, %c0_29, %c0_30] : memref<4x48x256xbf16, #tpu.memory_space<vmem>>, vector<1x48x256xbf16>
    %47 = vector.shape_cast %46 : vector<1x48x256xbf16> to vector<48x256xbf16>
    %48 = arith.extf %47 : vector<48x256xbf16> to vector<48x256xf32>
    %49 = arith.mulf %39, %48 : vector<48x256xf32>
    %cst_31 = arith.constant dense<0.000000e+00> : vector<256xf32>
    %50 = vector.multi_reduction <add>, %49, %cst_31 [0] : vector<48x256xf32> to vector<256xf32>
    %51 = vector.shape_cast %50 : vector<256xf32> to vector<1x256xf32>
    %c2_32 = arith.constant 2 : index
    %c0_33 = arith.constant 0 : index
    %c0_34 = arith.constant 0 : index
    %52 = vector.load %arg3[%c2_32, %c0_33, %c0_34] : memref<4x48x256xbf16, #tpu.memory_space<vmem>>, vector<1x48x256xbf16>
    %53 = vector.shape_cast %52 : vector<1x48x256xbf16> to vector<48x256xbf16>
    %54 = arith.extf %53 : vector<48x256xbf16> to vector<48x256xf32>
    %55 = arith.mulf %39, %54 : vector<48x256xf32>
    %cst_35 = arith.constant dense<0.000000e+00> : vector<256xf32>
    %56 = vector.multi_reduction <add>, %55, %cst_35 [0] : vector<48x256xf32> to vector<256xf32>
    %57 = vector.shape_cast %56 : vector<256xf32> to vector<1x256xf32>
    %c3_36 = arith.constant 3 : index
    %c0_37 = arith.constant 0 : index
    %c0_38 = arith.constant 0 : index
    %58 = vector.load %arg3[%c3_36, %c0_37, %c0_38] : memref<4x48x256xbf16, #tpu.memory_space<vmem>>, vector<1x48x256xbf16>
    %59 = vector.shape_cast %58 : vector<1x48x256xbf16> to vector<48x256xbf16>
    %60 = arith.extf %59 : vector<48x256xbf16> to vector<48x256xf32>
    %61 = arith.mulf %39, %60 : vector<48x256xf32>
    %cst_39 = arith.constant dense<0.000000e+00> : vector<256xf32>
    %62 = vector.multi_reduction <add>, %61, %cst_39 [0] : vector<48x256xf32> to vector<256xf32>
    %63 = vector.shape_cast %62 : vector<256xf32> to vector<1x256xf32>
    %c1_40 = arith.constant 1 : index
    %c0_41 = arith.constant 0 : index
    %c0_42 = arith.constant 0 : index
    %64 = vector.load %arg5[%c1_40, %c0_41, %c0_42] : memref<2x4x256xf32, #tpu.memory_space<vmem>>, vector<1x4x256xf32>
    %65 = vector.shape_cast %64 : vector<1x4x256xf32> to vector<4x256xf32>
    %66 = tpu.concatenate %45, %51, %57, %63 in 0 : vector<1x256xf32>, vector<1x256xf32>, vector<1x256xf32>, vector<1x256xf32> -> vector<4x256xf32>
    %67 = arith.addf %65, %66 : vector<4x256xf32>
    %c1_43 = arith.constant 1 : index
    %c0_44 = arith.constant 0 : index
    %c0_45 = arith.constant 0 : index
    %68 = vector.load %arg5[%c1_43, %c0_44, %c0_45] : memref<2x4x256xf32, #tpu.memory_space<vmem>>, vector<1x4x256xf32>
    %69 = vector.shape_cast %68 : vector<1x4x256xf32> to vector<4x256xf32>
    %70 = vector.shape_cast %67 : vector<4x256xf32> to vector<1x4x256xf32>
    tpu.vector_store %arg5[%c1_43, %c0_44, %c0_45], %70 {strides = array<i32>} : memref<2x4x256xf32, #tpu.memory_space<vmem>>, vector<1x4x256xf32>,
    return
  }
  func.func @transform_0(%arg0: i32, %arg1: i32) -> (i32, i32, i32) {
    %c0_i32 = arith.constant 0 : i32
    %c0_i32_0 = arith.constant 0 : i32
    return %c0_i32, %arg1, %arg0 : i32, i32, i32
  }
  func.func @transform_1(%arg0: i32, %arg1: i32) -> (i32, i32, i32) {
    %c0_i32 = arith.constant 0 : i32
    %c0_i32_0 = arith.constant 0 : i32
    return %c0_i32, %arg1, %arg0 : i32, i32, i32
  }
  func.func @transform_2(%arg0: i32, %arg1: i32) -> (i32, i32) {
    %c0_i32 = arith.constant 0 : i32
    %c0_i32_0 = arith.constant 0 : i32
    return %c0_i32, %arg0 : i32, i32
  }
  func.func @transform_3(%arg0: i32, %arg1: i32) -> (i32, i32, i32) {
    %c0_i32 = arith.constant 0 : i32
    %c0_i32_0 = arith.constant 0 : i32
    %c0_i32_1 = arith.constant 0 : i32
    return %c0_i32, %c0_i32_0, %arg0 : i32, i32, i32
  }
}

</mosaic_0001>

<bundles_post_ra>
// kernel: tpu_custom_call.1
= control target key start
LH: loop header
LB: loop body
LE: loop exit
PB: predicated region body
PF: predicated region fallthrough
CT: control target
= control target key end

     0   :  { %8 = vsyncpa [#allocation3], 0  ;;  %s1134_s0 = inlined_call_operand.hbm [shape: bf16[2,48,256], index: 0, kind: input, shape index: {}]   ;;  %s1135_s1 = inlined_call_operand.hbm [shape: bf16[4,48,256], index: 1, kind: input, shape index: {}]   ;;  %s1136_s2 = inlined_call_operand.hbm [shape: f32[4,256], index: 2, kind: input, shape index: {}]   ;;  %s1137_s3 = inlined_call_operand.hbm [shape: f32[2,4,256], index: 3, kind: output, shape index: {}]  }
   0x1   :  { %9 = vsyncpa [#allocation6], 0 }
   0x2   :  { %10 = vsyncpa [#allocation4], 0  ;;  %s841_s12 = smov [#allocation5]   ;;  %s842_s14 = smov [#allocation2]  }
   0x3   :  { %s28_s13 = sshll.u32 %s841_s12, 4  ;;  %s16_s15 = sshll.u32 %s842_s14, 4  ;;  %s29_s13 = int_to_ptr.vmem [resolvable:$true] %s28_s13  ;;  %s868_s15 = int_to_ptr.vmem [resolvable:$true] %s16_s15 }
   0x4   :  { %s571_s18 = scalar_lea.hbm %s1135_s1, 3072 }
   0x5   :  { %p572_p0 = scmp.ne.s32.totalorder %s1135_s1, %s571_s18  ;;  %p575_p1 = scmp.lt.u32.totalorder %s571_s18, %s1135_s1 }
   0x7   :  { %p577_p2 = pnand %p575_p1, %p572_p0 }
   0x9   :  { %580 = shalt.err (!%p577_p2)
}
   0xa   :  { %s581_s23 = scalar_lea.vmem %s29_s13, 3072  ;;  %p586_p4 = scmp.lt.s32.totalorder %s29_s13, %s29_s13 }
   0xb   :  { %p582_p3 = scmp.ne.s32.totalorder %s29_s13, %s581_s23  ;;  %p587_p5 = scmp.lt.s32.totalorder %s581_s23, %s581_s23 }
   0xd   :  { %p588_p6 = por %p587_p5, %p586_p4 }
   0xf   :  { %p589_p7 = pnand %p588_p6, %p582_p3 }
  0x11   :  { %592 = shalt.err (!%p589_p7)
}
  0x12   :  { %s843_s24 = smov 128   ;;  %s844_s25 = smov 8  }
  0x13   :  { %34 = dma.hbm_to_vmem [thread:$0]  %s1135_s1, 3072, %s29_s13, [#allocation6], %s843_s24, %s843_s24, %s844_s25  }
  0x14   :  { %s593_s30 = scalar_lea.hbm %s1134_s0, 1536 }
  0x15   :  { %p594_p8 = scmp.ne.s32.totalorder %s1134_s0, %s593_s30  ;;  %p597_p9 = scmp.lt.u32.totalorder %s593_s30, %s1134_s0 }
  0x17   :  { %p599_p10 = pnand %p597_p9, %p594_p8 }
  0x19   :  { %602 = shalt.err (!%p599_p10)
}
  0x1a   :  { %s603_s8 = scalar_lea.vmem %s868_s15, 1536  ;;  %p608_p12 = scmp.lt.s32.totalorder %s868_s15, %s868_s15 }
  0x1b   :  { %p604_p11 = scmp.ne.s32.totalorder %s868_s15, %s603_s8  ;;  %p609_p13 = scmp.lt.s32.totalorder %s603_s8, %s603_s8 }
  0x1d   :  { %p610_p0 = por %p609_p13, %p608_p12 }
  0x1f   :  { %p611_p1 = pnand %p610_p0, %p604_p11 }
  0x21   :  { %614 = shalt.err (!%p611_p1)
}
  0x22   :  { %22 = dma.hbm_to_vmem [thread:$0]  %s1134_s0, 1536, %s868_s15, [#allocation3], %s843_s24, %s843_s24, %s844_s25  }
  0x23   :  { %s845_s10 = smov [#allocation7]   ;;  %s615_s14 = scalar_lea.hbm %s1136_s2, 128 }
  0x24   :  { %s41_s11 = sshll.u32 %s845_s10, 4  ;;  %p616_p2 = scmp.ne.s32.totalorder %s1136_s2, %s615_s14  ;;  %s42_s11 = int_to_ptr.vmem [resolvable:$true] %s41_s11 }
  0x25   :  { %p619_p3 = scmp.lt.u32.totalorder %s615_s14, %s1136_s2 }
  0x27   :  { %p621_p4 = pnand %p619_p3, %p616_p2 }
  0x29   :  { %624 = shalt.err (!%p621_p4)
}
  0x2a   :  { %s625_s20 = scalar_lea.vmem %s42_s11, 128  ;;  %p630_p6 = scmp.lt.s32.totalorder %s42_s11, %s42_s11 }
  0x2b   :  { %p626_p5 = scmp.ne.s32.totalorder %s42_s11, %s625_s20  ;;  %p631_p7 = scmp.lt.s32.totalorder %s625_s20, %s625_s20 }
  0x2d   :  { %p632_p8 = por %p631_p7, %p630_p6 }
  0x2f   :  { %p633_p9 = pnand %p632_p8, %p626_p5 }
  0x31   :  { %636 = shalt.err (!%p633_p9)
}
  0x32   :  { %44 = dma.hbm_to_vmem [thread:$0]  %s1136_s2, 128, %s42_s11, [#allocation6]  }
  0x33   :  { %659 = dma.done.wait [#allocation3], 1536  }
  0x34   :  { %660 = vsyncadd [#allocation3], 4294965760 }
  0x35   :  { %661 = dma.done.wait [#allocation6], 3200  }
  0x36   :  { %662 = vsyncadd [#allocation6], 4294964096  ;;  %v917_v0 = vld [vmem:[#allocation2] sm:$0xff]  ;;  %v919_v1 = vld [vmem:[#allocation2 + $0x8] sm:$0xff]  ;;  %v846_v22 = vmov 1935823168   ;;  %v677_v25 = vlaneseq }
  0x37   :  { %v921_v2 = vld [vmem:[#allocation2 + $0x10] sm:$0xff]  ;;  %v923_v3 = vld [vmem:[#allocation2 + $0x18] sm:$0xff]  ;;  %v925_v4 = vld [vmem:[#allocation2 + $0x20] sm:$0xff]  ;;  %v675_v23 = vunpack.c.l.s4 %v846_v22  ;;  %vm291_vm0 = vcmask 1040384   ;;  %vm294_vm1 = vcmask 1041408   ;;  %vm297_vm2 = vcmask 1042432  }
  0x38   :  { %v927_v5 = vld [vmem:[#allocation2 + $0x28] sm:$0xff]  ;;  %v929_v6 = vld [vmem:[#allocation5] sm:$0xff]  ;;  %v933_v8 = vld [vmem:[#allocation5 + $0x10] sm:$0xff]  ;;  %v678_v26 = vshrl.u32 %v677_v25, 7  ;;  %s847_s2 = smov [#allocation8]  }
  0x39   :  { %v931_v7 = vld [vmem:[#allocation5 + $0x8] sm:$0xff]  ;;  %v935_v9 = vld [vmem:[#allocation5 + $0x18] sm:$0xff]  ;;  %v937_v10 = vld [vmem:[#allocation5 + $0x20] sm:$0xff]  ;;  %665 = vmul.bf16.f32.vacc0 %v929_v6, %v917_v0  ;;  %v676_v24 = vunpack.c.0.s8 %v675_v23  ;;  %s552_s21 = sshll.u32 %s847_s2, 4  ;;  %s553_s21 = int_to_ptr.vmem [resolvable:$true] %s552_s21 }
  0x3a   :  { %v939_v11 = vld [vmem:[#allocation5 + $0x28] sm:$0xff]  ;;  %v941_v12 = vld [vmem:[#allocation5 + $0x30] sm:$0xff]  ;;  %v943_v13 = vld [vmem:[#allocation5 + $0x38] sm:$0xff]  ;;  %666 = vmac.bf16.f32.vacc0 %v931_v7, %v919_v1  ;;  %s637_s22 = scalar_lea.vmem %s553_s21, 256  ;;  %p642_p11 = scmp.lt.s32.totalorder %s553_s21, %s553_s21 }
  0x3b   :  { %v945_v14 = vld [vmem:[#allocation5 + $0x40] sm:$0xff]  ;;  %v951_v15 = vld [vmem:[#allocation5 + $0x48] sm:$0xff]  ;;  %v953_v16 = vld [vmem:[#allocation5 + $0x50] sm:$0xff]  ;;  %667 = vmac.bf16.f32.vacc0 %v933_v8, %v921_v2  ;;  %v965_v27 = vsub.s32 %v676_v24, %v678_v26  ;;  %687 = vmul.bf16.f32.vacc1 %v941_v12, %v917_v0  ;;  %p638_p10 = scmp.ne.s32.totalorder %s553_s21, %s637_s22  ;;  %p643_p12 = scmp.lt.s32.totalorder %s637_s22, %s637_s22 }
  0x3c   :  { %v957_v17 = vld [vmem:[#allocation5 + $0x58] sm:$0xff]  ;;  %668 = vmac.bf16.f32.vacc0 %v935_v9, %v923_v3  ;;  %688 = vmac.bf16.f32.vacc1 %v943_v13, %v919_v1  ;;  %v973_v30 = vld [vmem:[#allocation5 + $0x60] sm:$0xff]  ;;  %v975_v31 = vld [vmem:[#allocation5 + $0x68] sm:$0xff] }
  0x3d   :  { %669 = vmac.bf16.f32.vacc0 %v937_v10, %v925_v4  ;;  %689 = vmac.bf16.f32.vacc1 %v945_v14, %v921_v2  ;;  %v979_v34 = vld [vmem:[#allocation5 + $0x70] sm:$0xff]  ;;  %v981_v35 = vld [vmem:[#allocation5 + $0x78] sm:$0xff]  ;;  %v985_v38 = vld [vmem:[#allocation5 + $0x80] sm:$0xff]  ;;  %709 = vmul.bf16.f32.vacc2 %v973_v30, %v917_v0  ;;  %p644_p13 = por %p643_p12, %p642_p11 }
  0x3e   :  { %670 = vmac.bf16.f32.vacc0 %v939_v11, %v927_v5  ;;  %690 = vmac.bf16.f32.vacc1 %v951_v15, %v923_v3  ;;  %v987_v39 = vld [vmem:[#allocation5 + $0x88] sm:$0xff]  ;;  %v995_v56 = vld [vmem:[#allocation5 + $0x90] sm:$0xff]  ;;  %710 = vmac.bf16.f32.vacc2 %v975_v31, %v919_v1  ;;  %v1001_v57 = vld [vmem:[#allocation5 + $0x98] sm:$0xff] }
  0x3f   :  { %691 = vmac.bf16.f32.vacc1 %v953_v16, %v925_v4  ;;  %v1003_v61 = vld [vmem:[#allocation5 + $0xa0] sm:$0xff]  ;;  %711 = vmac.bf16.f32.vacc2 %v979_v34, %v921_v2  ;;  %v1007_v62 = vld [vmem:[#allocation5 + $0xa8] sm:$0xff]  ;;  %v1013_v22 = vld [vmem:[#allocation5 + $0xb8] sm:$0xff]  ;;  %731 = vmul.bf16.f32.vacc3 %v995_v56, %v917_v0  ;;  %p645_p0 = pnand %p644_p13, %p638_p10 }
  0x40   :  { %v671_v18 = vmovacc.add.low.vacc0  ;;  %692 = vmac.bf16.f32.vacc1 %v957_v17, %v927_v5  ;;  %712 = vmac.bf16.f32.vacc2 %v981_v35, %v923_v3  ;;  %732 = vmac.bf16.f32.vacc3 %v1001_v57, %v919_v1  ;;  %v1039_v1 = vld [vmem:[#allocation2 + $0x50] sm:$0xff] }
  0x41   :  { %v672_v19 = vmovacc.add.high.vacc0  ;;  %713 = vmac.bf16.f32.vacc2 %v985_v38, %v925_v4  ;;  %733 = vmac.bf16.f32.vacc3 %v1003_v61, %v921_v2 }
  0x42   :  { %v693_v44 = vmovacc.add.low.vacc1  ;;  %714 = vmac.bf16.f32.vacc2 %v987_v39, %v927_v5  ;;  %734 = vmac.bf16.f32.vacc3 %v1007_v62, %v923_v3 }
  0x43   :  { %v673_v20 = vcombine.low %v671_v18, %v672_v19  ;;  %v674_v21 = vcombine.high %v671_v18, %v672_v19  ;;  %v694_v45 = vmovacc.add.high.vacc1  ;;  %v1009_v19 = vld [vmem:[#allocation5 + $0xb0] sm:$0xff] }
  0x44   :  { %v715_v24 = vmovacc.add.low.vacc2  ;;  %735 = vmac.bf16.f32.vacc3 %v1009_v19, %v925_v4 }
  0x45   :  { %v680_v28 = vrot.slane %v673_v20, %v965_v27  ;;  %v686_v29 = vrot.slane %v674_v21, %v965_v27  ;;  %v695_v46 = vcombine.low %v693_v44, %v694_v45  ;;  %v696_v47 = vcombine.high %v693_v44, %v694_v45  ;;  %v1027_v44 = vld [vmem:[#allocation2 + $0x38] sm:$0xff] }
  0x46   :  { %v716_v25 = vmovacc.add.high.vacc2  ;;  %736 = vmac.bf16.f32.vacc3 %v1013_v22, %v927_v5 }
  0x47   :  { %v114_v32 = vrot.slane %v680_v28, 4  ;;  %v125_v33 = vrot.slane %v686_v29, 4  ;;  %v702_v48 = vrot.slane %v695_v46, %v965_v27  ;;  %v708_v49 = vrot.slane %v696_v47, %v965_v27  ;;  %v1032_v46 = vld [vmem:[#allocation2 + $0x40] sm:$0xff] }
  0x48   :  { %v717_v26 = vcombine.low %v715_v24, %v716_v25 }
  0x49   :  { %v115_v36 = vadd.f32 %v680_v28, %v114_v32  ;;  %v126_v37 = vadd.f32 %v686_v29, %v125_v33  ;;  %v167_v51 = vrot.slane %v702_v48, 4  ;;  %v178_v52 = vrot.slane %v708_v49, 4 }
  0x4a   :  { %v718_v28 = vcombine.high %v715_v24, %v716_v25  ;;  %v724_v29 = vrot.slane %v717_v26, %v965_v27 }
  0x4b   :  { %v116_v40 = vrot.slane %v115_v36, 2  ;;  %v127_v41 = vrot.slane %v126_v37, 2  ;;  %v168_v54 = vadd.f32 %v702_v48, %v167_v51  ;;  %v179_v55 = vadd.f32 %v708_v49, %v178_v52  ;;  %v1035_v49 = vld [vmem:[#allocation2 + $0x48] sm:$0xff] }
  0x4c   :  { %v730_v32 = vrot.slane %v718_v28, %v965_v27 }
  0x4d   :  { %v117_v42 = vadd.f32 %v116_v40, %v115_v36  ;;  %v128_v43 = vadd.f32 %v127_v41, %v126_v37  ;;  %v169_v59 = vrot.slane %v168_v54, 2  ;;  %v180_v60 = vrot.slane %v179_v55, 2  ;;  %v1025_v41 = vld [vmem:[#allocation2 + $0x30] sm:$0xff] }
  0x4e   :  { %v220_v37 = vrot.slane %v724_v29, 4  ;;  %v231_v40 = vrot.slane %v730_v32, 4  ;;  %753 = vmul.bf16.f32.vacc0 %v1025_v41, %v929_v6  ;;  %775 = vmul.bf16.f32.vacc2 %v1025_v41, %v941_v12 }
  0x4f   :  { %v118_v50 = vrot.slane %v117_v42, 1  ;;  %v129_v53 = vrot.slane %v128_v43, 1  ;;  %v170_v63 = vadd.f32 %v169_v59, %v168_v54  ;;  %v181_v18 = vadd.f32 %v180_v60, %v179_v55 }
  0x50   :  { %v737_v54 = vmovacc.add.low.vacc3  ;;  %754 = vmac.bf16.f32.vacc0 %v1027_v44, %v931_v7  ;;  %776 = vmac.bf16.f32.vacc2 %v1027_v44, %v943_v13  ;;  %797 = vmul.bf16.f32.vacc1 %v1025_v41, %v973_v30 }
  0x51   :  { %v119_v58 = vadd.f32 %v118_v50, %v117_v42  ;;  %v130_v20 = vadd.f32 %v129_v53, %v128_v43  ;;  %v171_v21 = vrot.slane %v170_v63, 1  ;;  %v182_v23 = vrot.slane %v181_v18, 1  ;;  %v1043_v53 = vld [vmem:[#allocation2 + $0x58] sm:$0xff] }
  0x52   :  { %v221_v42 = vadd.f32 %v724_v29, %v220_v37  ;;  %v232_v43 = vadd.f32 %v730_v32, %v231_v40  ;;  %v738_v55 = vmovacc.add.high.vacc3  ;;  %755 = vmac.bf16.f32.vacc0 %v1032_v46, %v933_v8  ;;  %v1067_v8 = vld [vmem:[#allocation7] sm:$0xff] }
  0x53   :  { %v172_v33 = vadd.f32 %v171_v21, %v170_v63  ;;  %v183_v36 = vadd.f32 %v182_v23, %v181_v18  ;;  %756 = vmac.bf16.f32.vacc0 %v1035_v49, %v935_v9  ;;  %777 = vmac.bf16.f32.vacc2 %v1032_v46, %v945_v14 }
  0x54   :  { %v222_v47 = vrot.slane %v221_v42, 2  ;;  %v233_v48 = vrot.slane %v232_v43, 2  ;;  %v740_v59 = vcombine.high %v737_v54, %v738_v55  ;;  %757 = vmac.bf16.f32.vacc0 %v1039_v1, %v937_v10 }
  0x55   :  { %v292_v45 = vsel %vm291_vm0, %v119_v58, %v172_v33  ;;  %v293_v0 = vsel %vm291_vm0, %v130_v20, %v183_v36  ;;  %v739_v58 = vcombine.low %v737_v54, %v738_v55  ;;  %758 = vmac.bf16.f32.vacc0 %v1043_v53, %v939_v11 }
  0x56   :  { %v223_v50 = vadd.f32 %v222_v47, %v221_v42  ;;  %v234_v51 = vadd.f32 %v233_v48, %v232_v43  ;;  %v752_v60 = vrot.slane %v740_v59, %v965_v27  ;;  %778 = vmac.bf16.f32.vacc2 %v1035_v49, %v951_v15 }
  0x57   :  { %v746_v3 = vrot.slane %v739_v58, %v965_v27  ;;  %v759_v10 = vmovacc.add.low.vacc0  ;;  %779 = vmac.bf16.f32.vacc2 %v1039_v1, %v953_v16  ;;  %798 = vmac.bf16.f32.vacc1 %v1027_v44, %v975_v31 }
  0x58   :  { %v224_v2 = vrot.slane %v223_v50, 1  ;;  %v235_v52 = vrot.slane %v234_v51, 1  ;;  %v284_v20 = vrot.slane %v752_v60, 4  ;;  %v760_v12 = vmovacc.add.high.vacc0 }
  0x59   :  { %v273_v18 = vrot.slane %v746_v3, 4  ;;  %780 = vmac.bf16.f32.vacc2 %v1043_v53, %v957_v17  ;;  %799 = vmac.bf16.f32.vacc1 %v1032_v46, %v979_v34  ;;  %819 = vmul.bf16.f32.vacc3 %v1025_v41, %v995_v56 }
  0x5a   :  { %v225_v63 = vadd.f32 %v224_v2, %v223_v50  ;;  %v236_v21 = vadd.f32 %v235_v52, %v234_v51  ;;  %v285_v23 = vadd.f32 %v752_v60, %v284_v20  ;;  %v761_v40 = vcombine.low %v759_v10, %v760_v12 }
  0x5b   :  { %v274_v4 = vadd.f32 %v746_v3, %v273_v18  ;;  %v762_v42 = vcombine.high %v759_v10, %v760_v12  ;;  %v781_v11 = vmovacc.add.low.vacc2  ;;  %800 = vmac.bf16.f32.vacc1 %v1035_v49, %v981_v35 }
  0x5c   :  { %v295_v24 = vsel %vm294_vm1, %v292_v45, %v225_v63  ;;  %v286_v25 = vrot.slane %v285_v23, 2  ;;  %v296_v29 = vsel %vm294_vm1, %v293_v0, %v236_v21  ;;  %v768_v13 = vrot.slane %v761_v40, %v965_v27 }
  0x5d   :  { %v275_v5 = vrot.slane %v274_v4, 2  ;;  %v774_v43 = vrot.slane %v762_v42, %v965_v27  ;;  %v782_v48 = vmovacc.add.high.vacc2  ;;  %801 = vmac.bf16.f32.vacc1 %v1039_v1, %v985_v38 }
  0x5e   :  { %v287_v28 = vadd.f32 %v286_v25, %v285_v23  ;;  %v360_v45 = vrot.slane %v768_v13, 4  ;;  %802 = vmac.bf16.f32.vacc1 %v1043_v53, %v987_v39  ;;  %820 = vmac.bf16.f32.vacc3 %v1027_v44, %v1001_v57 }
  0x5f   :  { %v276_v26 = vadd.f32 %v275_v5, %v274_v4  ;;  %v371_v47 = vrot.slane %v774_v43, 4  ;;  %v783_v0 = vcombine.low %v781_v11, %v782_v48  ;;  %v784_v50 = vcombine.high %v781_v11, %v782_v48 }
  0x60   :  { %v288_v33 = vrot.slane %v287_v28, 1  ;;  %v361_v17 = vadd.f32 %v768_v13, %v360_v45  ;;  %v803_v31 = vmovacc.add.low.vacc1  ;;  %821 = vmac.bf16.f32.vacc3 %v1032_v46, %v1003_v61 }
  0x61   :  { %v277_v32 = vrot.slane %v276_v26, 1  ;;  %v790_v51 = vrot.slane %v783_v0, %v965_v27  ;;  %v796_v2 = vrot.slane %v784_v50, %v965_v27  ;;  %v372_v52 = vadd.f32 %v774_v43, %v371_v47 }
  0x62   :  { %v289_v7 = vadd.f32 %v288_v33, %v287_v28  ;;  %v362_v58 = vrot.slane %v361_v17, 2  ;;  %v804_v59 = vmovacc.add.high.vacc1  ;;  %822 = vmac.bf16.f32.vacc3 %v1035_v49, %v1007_v62 }
  0x63   :  { %v278_v6 = vadd.f32 %v277_v32, %v276_v26  ;;  %v412_v15 = vrot.slane %v790_v51, 4  ;;  %v423_v16 = vrot.slane %v796_v2, 4  ;;  %v373_v30 = vrot.slane %v372_v52, 2 }
  0x64   :  { %v299_v36 = vsel %vm297_vm2, %v296_v29, %v289_v7  ;;  %v805_v3 = vcombine.low %v803_v31, %v804_v59  ;;  %v806_v60 = vcombine.high %v803_v31, %v804_v59  ;;  %v363_v21 = vadd.f32 %v362_v58, %v361_v17 }
  0x65   :  { %v298_v9 = vsel %vm297_vm2, %v295_v24, %v278_v6  ;;  %v413_v54 = vadd.f32 %v790_v51, %v412_v15  ;;  %v424_v55 = vadd.f32 %v796_v2, %v423_v16  ;;  %v374_v39 = vadd.f32 %v373_v30, %v372_v52 }
  0x66   :  { %v302_v37 = vcombine.low %v298_v9, %v299_v36  ;;  %v812_v34 = vrot.slane %v805_v3, %v965_v27  ;;  %v818_v63 = vrot.slane %v806_v60, %v965_v27  ;;  %823 = vmac.bf16.f32.vacc3 %v1039_v1, %v1009_v19 }
  0x67   :  { %v414_v18 = vrot.slane %v413_v54, 2  ;;  %v425_v35 = vrot.slane %v424_v55, 2  ;;  %v364_v57 = vrot.slane %v363_v21, 1  ;;  %824 = vmac.bf16.f32.vacc3 %v1043_v53, %v1013_v22 }
  0x68   :  { %v304_v14 = vadd.f32 %v302_v37, %v1067_v8  ;;  %v464_v38 = vrot.slane %v812_v34, 4  ;;  %v475_v20 = vrot.slane %v818_v63, 4  ;;  %v375_v49 = vrot.slane %v374_v39, 1 }
  0x69   :  { %v415_v24 = vadd.f32 %v414_v18, %v413_v54  ;;  %v426_v5 = vadd.f32 %v425_v35, %v424_v55  ;;  %v825_v61 = vmovacc.add.low.vacc3  ;;  %v365_v1 = vadd.f32 %v364_v57, %v363_v21 }
  0x6a   :  { %305 = vst [vmem:[#allocation8] sm:$0xff] %v304_v14  ;;  %v465_v4 = vadd.f32 %v812_v34, %v464_v38  ;;  %v476_v23 = vadd.f32 %v818_v63, %v475_v20  ;;  %v826_v46 = vmovacc.add.high.vacc3  ;;  %v376_v10 = vadd.f32 %v375_v49, %v374_v39 }
  0x6b   :  { %v416_v41 = vrot.slane %v415_v24, 1  ;;  %v427_v33 = vrot.slane %v426_v5, 1 }
  0x6c   :  { %v466_v25 = vrot.slane %v465_v4, 2  ;;  %v477_v26 = vrot.slane %v476_v23, 2  ;;  %v827_v28 = vcombine.low %v825_v61, %v826_v46  ;;  %v828_v29 = vcombine.high %v825_v61, %v826_v46 }
  0x6d   :  { %v417_v9 = vadd.f32 %v416_v41, %v415_v24  ;;  %v428_v12 = vadd.f32 %v427_v33, %v426_v5 }
  0x6e   :  { %v467_v56 = vadd.f32 %v466_v25, %v465_v4  ;;  %v478_v44 = vadd.f32 %v477_v26, %v476_v23  ;;  %v834_v32 = vrot.slane %v827_v28, %v965_v27  ;;  %v840_v62 = vrot.slane %v828_v29, %v965_v27 }
  0x6f   :  { %v535_v14 = vsel %vm291_vm0, %v365_v1, %v417_v9  ;;  %v536_v45 = vsel %vm291_vm0, %v376_v10, %v428_v12 }
  0x70   :  { %v516_v6 = vrot.slane %v834_v32, 4  ;;  %v468_v7 = vrot.slane %v467_v56, 1  ;;  %v527_v19 = vrot.slane %v840_v62, 4  ;;  %v479_v36 = vrot.slane %v478_v44, 1 }
  0x72   :  { %v517_v37 = vadd.f32 %v834_v32, %v516_v6  ;;  %v528_v22 = vadd.f32 %v840_v62, %v527_v19  ;;  %v469_v40 = vadd.f32 %v468_v7, %v467_v56  ;;  %v480_v13 = vadd.f32 %v479_v36, %v478_v44 }
  0x74   :  { %v518_v53 = vrot.slane %v517_v37, 2  ;;  %v529_v42 = vrot.slane %v528_v22, 2  ;;  %v537_v48 = vsel %vm294_vm1, %v535_v14, %v469_v40  ;;  %v538_v50 = vsel %vm294_vm1, %v536_v45, %v480_v13 }
  0x76   :  { %v519_v43 = vadd.f32 %v518_v53, %v517_v37  ;;  %v530_v27 = vadd.f32 %v529_v42, %v528_v22 }
  0x78   :  { %v520_v47 = vrot.slane %v519_v43, 1  ;;  %v531_v11 = vrot.slane %v530_v27, 1 }
  0x7a   :  { %v521_v0 = vadd.f32 %v520_v47, %v519_v43  ;;  %v532_v51 = vadd.f32 %v531_v11, %v530_v27 }
  0x7c   :  { %v539_v2 = vsel %vm297_vm2, %v537_v48, %v521_v0  ;;  %v540_v15 = vsel %vm297_vm2, %v538_v50, %v532_v51 }
  0x7d   :  { %v543_v16 = vcombine.low %v539_v2, %v540_v15 }
  0x7f   :  { %v545_v17 = vadd.f32 %v543_v16, %v1067_v8 }
  0x81   :  { %546 = vst [vmem:[#allocation8 + $0x8] sm:$0xff] %v545_v17 }
  0x82   :  { %648 = shalt.err (!%p645_p0)
}
  0x83   :  { %s649_s27 = scalar_lea.hbm %s1137_s3, 256 }
  0x84   :  { %p650_p1 = scmp.ne.s32.totalorder %s1137_s3, %s649_s27  ;;  %p653_p2 = scmp.lt.u32.totalorder %s649_s27, %s1137_s3 }
  0x86   :  { %p655_p3 = pnand %p653_p2, %p650_p1 }
  0x88   :  { %658 = shalt.err (!%p655_p3)
}
  0x89   :  { %558 = dma.vmem_to_hbm [thread:$0]  %s553_s21, 256, %s1137_s3, [#allocation4], %s843_s24, %s843_s24, %s844_s25  }
  0x8a   :  { %663 = dma.done.wait [#allocation4], 256  }
  0x8b   :  { %664 = vsyncadd [#allocation4], 4294967040 }
  0x8c   :  { %562 = vsyncpa [#allocation3], 1 }
  0x8d   :  { %563 = vsyncpa [#allocation6], 1 }
  0x8e   :  { %564 = vsyncpa [#allocation4], 1 }

</bundles_post_ra>
